<compile_context>
chip_gen: v7x
topology: tpu7x:2x2x1
jax: 0.10.0
libtpu: 0.0.40
codegen_flags: <defaults>
</compile_context>

<pallas_src>
import functools
import math

import jax
import jax.numpy as jnp
from jax import lax
from jax.experimental import pallas as pl
from jax.experimental.pallas import tpu as pltpu


# ---------------------------------------------------------------------------
# PE table (replicates the PyTorch registered buffer, built once on the host).
# ---------------------------------------------------------------------------
def make_sinusoidal_pe(max_len, d_model, dtype=jnp.float32):
    """PyTorch PositionalEncoding buffer: shape (max_len, 1, d_model)."""
    position = jnp.arange(max_len, dtype=jnp.float32)[:, None]            # (S, 1)
    div_term = jnp.exp(jnp.arange(0, d_model, 2, dtype=jnp.float32)
                       * (-math.log(10000.0) / d_model))                  # (D/2,)
    angles = position * div_term                                          # (S, D/2)
    pe = jnp.zeros((max_len, d_model), jnp.float32)
    pe = pe.at[:, 0::2].set(jnp.sin(angles))
    pe = pe.at[:, 1::2].set(jnp.cos(angles))
    return pe[:, None, :].astype(dtype)                                   # (S, 1, D)


# ---------------------------------------------------------------------------
# Fused input_projection + PE add + LayerNorm  (batch-first, CoreTransformer).
# ---------------------------------------------------------------------------
def _fused_proj_pe_ln_kernel(x_ref, w_ref, b_ref, pe_ref, g_ref, beta_ref,
                             o_ref, acc_ref, *, eps):
    """One (batch, seq-tile) output block; K is the last (reduction) grid axis.

    x_ref:   (1, bs, bk)  input activations
    w_ref:   (bk, N)      input_projection weight, (in, out) layout
    b_ref:   (1, N)       input_projection bias
    pe_ref:  (bs, N)      precomputed sinusoidal PE rows for this seq tile
    g_ref:   (1, N)       LayerNorm gamma
    beta_ref:(1, N)       LayerNorm beta
    o_ref:   (1, bs, N)
    acc_ref: (bs, N)      f32 accumulator scratch (lives across the K axis)
    """
    k = pl.program_id(2)

    @pl.when(k == 0)
    def _():
        acc_ref[...] = jnp.zeros_like(acc_ref)

    acc_ref[...] += jnp.dot(x_ref[0], w_ref[...],
                            preferred_element_type=jnp.float32)

    @pl.when(k == pl.num_programs(2) - 1)
    def _():
        # Epilogue: bias + PE add + LayerNorm, all in f32, one cast at the
        # store (review: avoid double rounding for bf16 activations).
        y = (acc_ref[...]
             + b_ref[...].astype(jnp.float32)
             + pe_ref[...].astype(jnp.float32))
        mean = jnp.mean(y, axis=-1, keepdims=True)
        c = y - mean
        var = jnp.mean(c * c, axis=-1, keepdims=True)
        yn = c * lax.rsqrt(var + eps)
        yn = yn * g_ref[...].astype(jnp.float32) + beta_ref[...].astype(jnp.float32)
        o_ref[0] = yn.astype(o_ref.dtype)
        # TODO(synk): nn.Dropout after the PE add is identity (eval-mode).


def fused_input_projection_pe_layernorm(x, w, b, pe, gamma, beta, *,
                                        block_s=None, block_k=None,
                                        eps=1e-5, out_dtype=None):
    """x: (B, S, K) batch-first; w: (K, N); b/gamma/beta: (N,); pe: (S, N).

    Returns LayerNorm(x @ w + b + pe[seq]) with shape (B, S, N), i.e. the
    CoreTransformer pipeline up to (and including) self.layer_norm.
    """
    B, S, K = x.shape
    Kw, N = w.shape
    assert Kw == K and pe.shape == (S, N)
    assert b.shape == (N,) and gamma.shape == (N,) and beta.shape == (N,)
    out_dtype = out_dtype or x.dtype

    # seq tile: one of the last two dims of the PE/output blocks -> multiple of
    # 8 or the full S.  Ragged seq tail is fine (padded rows are masked on the
    # store and every row is independent).
    if block_s is None:
        block_s = S if S <= 256 else 256
    if block_s != S:
        block_s = max(8, (min(block_s, S) // 8) * 8)

    # K tile: must divide K exactly (a ragged reduction tail would feed padding
    # into the accumulator) and be a multiple of 128 unless it is the full K.
    if block_k is None:
        if K <= 2048:
            block_k = K
        else:
            block_k = next((t for t in (1024, 512, 256, 128) if K % t == 0), K)
    assert block_k == K or (K % block_k == 0 and block_k % 128 == 0), \
        "block_k must equal K, or divide K and be a multiple of 128"

    grid = (B, pl.cdiv(S, block_s), K // block_k)

    b2 = b.reshape(1, N)
    g2 = gamma.reshape(1, N)
    be2 = beta.reshape(1, N)

    itemsize = jnp.dtype(x.dtype).itemsize
    cost = pl.CostEstimate(
        flops=2 * B * S * K * N + 8 * B * S * N,
        transcendentals=B * S,                       # one rsqrt per output row
        bytes_accessed=(B * S * K + K * N + S * N + 3 * N + B * S * N) * itemsize,
    )

    kernel = functools.partial(_fused_proj_pe_ln_kernel, eps=eps)

    return pl.pallas_call(
        kernel,
        out_shape=jax.ShapeDtypeStruct((B, S, N), out_dtype),
        grid=grid,
        in_specs=[
            pl.BlockSpec((1, block_s, block_k), lambda bi, si, ki: (bi, si, ki)),
            pl.BlockSpec((block_k, N), lambda bi, si, ki: (ki, 0)),
            pl.BlockSpec((1, N), lambda bi, si, ki: (0, 0)),
            pl.BlockSpec((block_s, N), lambda bi, si, ki: (si, 0)),
            pl.BlockSpec((1, N), lambda bi, si, ki: (0, 0)),
            pl.BlockSpec((1, N), lambda bi, si, ki: (0, 0)),
        ],
        out_specs=pl.BlockSpec((1, block_s, N), lambda bi, si, ki: (bi, si, 0)),
        scratch_shapes=[pltpu.VMEM((block_s, N), jnp.float32)],
        compiler_params=pltpu.CompilerParams(
            dimension_semantics=("parallel", "parallel", "arbitrary"),
            vmem_limit_bytes=48 * 1024 * 1024,   # safe on v5e/v6e (128 MiB) and v7x (64 MiB)
        ),
        cost_estimate=cost,
    )(x, w, b2, pe, g2, be2)


# ---------------------------------------------------------------------------
# Standalone PE add (seq-first), kept as a fallback when fusion isn't possible.
# ---------------------------------------------------------------------------
def _pe_add_kernel(x_ref, pe_ref, o_ref):
    # f32 compute, single cast at the store (avoids double rounding for bf16).
    o_ref[...] = (x_ref[...].astype(jnp.float32)
                  + pe_ref[...].astype(jnp.float32)).astype(o_ref.dtype)


def positional_encoding(x, pe, *, block_s=None, target_tile_bytes=6 << 20):
    """x: (S, B, D) seq-first; pe: (max_len, 1, D) precomputed buffer.

    Returns x + pe[:S]  (nn.Dropout is identity in eval mode).
    """
    S, B, D = x.shape
    assert pe.shape[0] >= S and pe.shape[1:] == (1, D)
    pe = pe[:S]
    itemsize = jnp.dtype(x.dtype).itemsize
    if block_s is None:
        row_bytes = max(1, B * D * itemsize)
        block_s = max(1, min(S, target_tile_bytes // row_bytes))
        # No multiple-of-8 rounding: block_s is the leading (non-layout) dim;
        # the sublane/lane dims are (B, D), which stay full-array here.
    grid = (pl.cdiv(S, block_s),)

    cost = pl.CostEstimate(
        flops=S * B * D,
        transcendentals=0,
        bytes_accessed=(2 * S * B * D + S * D) * itemsize,
    )

    # TODO(synk): for B not a multiple of 8 (f32) / 16 (bf16) the (B, D) block
    # is sublane-under-packed; pad B or prefer the fused matmul-epilogue kernel.
    return pl.pallas_call(
        _pe_add_kernel,
        out_shape=jax.ShapeDtypeStruct((S, B, D), x.dtype),
        grid=grid,
        in_specs=[pl.BlockSpec((block_s, B, D), lambda i: (i, 0, 0)),
                  pl.BlockSpec((block_s, 1, D), lambda i: (i, 0, 0))],
        out_specs=pl.BlockSpec((block_s, B, D), lambda i: (i, 0, 0)),
        input_output_aliases={0: 0},     # pure in-place add: donate x's buffer
        compiler_params=pltpu.CompilerParams(
            dimension_semantics=("parallel",),
            vmem_limit_bytes=48 * 1024 * 1024,
        ),
        cost_estimate=cost,
    )(x, pe)


# ---------------------------------------------------------------------------
# Smoke test against pure-JAX references of the PyTorch forward (eval mode).
# ---------------------------------------------------------------------------
if __name__ == "__main__":
    key = jax.random.PRNGKey(0)
    k0, k1, k2, k3, k4, k5 = jax.random.split(key, 6)

    # ---- fused input_projection + PE + LayerNorm (batch-first) -------------
    B, S, IN_DIM, FF = 2, 16, 32, 256
    x = jax.random.normal(k0, (B, S, IN_DIM), jnp.float32)
    w = jax.random.normal(k1, (IN_DIM, FF), jnp.float32) / math.sqrt(IN_DIM)
    b = 0.1 * jax.random.normal(k2, (FF,), jnp.float32)
    gamma = 1.0 + 0.1 * jax.random.normal(k3, (FF,), jnp.float32)
    beta = 0.1 * jax.random.normal(k4, (FF,), jnp.float32)
    pe_buf = make_sinusoidal_pe(S, FF)              # (S, 1, FF), PyTorch layout
    pe2d = pe_buf[:, 0, :]                          # (S, FF)

    out = fused_input_projection_pe_layernorm(x, w, b, pe2d, gamma, beta)
    out = jax.block_until_ready(out)

    # Reference: f32 matmul (HIGHEST precision), PE add per seq position, LN.
    y = jnp.dot(x, w, precision=lax.Precision.HIGHEST) + b
    y = y + pe2d[None, :, :]
    mean = jnp.mean(y, axis=-1, keepdims=True)
    var = jnp.mean((y - mean) ** 2, axis=-1, keepdims=True)
    ref = (y - mean) * lax.rsqrt(var + 1e-5) * gamma + beta
    assert out.shape == (B, S, FF)
    # Tolerance covers MXU f32 multi-pass matmul vs. HIGHEST-precision XLA dot.
    assert jnp.allclose(out, ref, atol=2e-2, rtol=2e-2), "fused kernel mismatch"

    # ---- standalone PE add fallback (seq-first, sublane-dense B=8) ---------
    S2, B2, D2 = 16, 8, 256
    x2 = jax.random.normal(k5, (S2, B2, D2), jnp.float32)
    pe_buf2 = make_sinusoidal_pe(S2, D2)            # (S2, 1, D2)
    out2 = jax.block_until_ready(positional_encoding(x2, pe_buf2))
    ref2 = x2 + pe_buf2[:S2]
    assert out2.shape == (S2, B2, D2)
    assert jnp.allclose(out2, ref2, atol=1e-6, rtol=1e-6), "PE kernel mismatch"

    print("KERNEL_OK")
</pallas_src>

<mosaic_0001>
module attributes {stable_mosaic.version = 11 : i64} {
  func.func @_fused_proj_pe_ln_kernel(%arg0: i32, %arg1: i32, %arg2: i32, %arg3: memref<1x16x32xf32, #tpu.memory_space<vmem>>, %arg4: memref<32x256xf32, #tpu.memory_space<vmem>>, %arg5: memref<1x256xf32, #tpu.memory_space<vmem>>, %arg6: memref<16x256xf32, #tpu.memory_space<vmem>>, %arg7: memref<1x256xf32, #tpu.memory_space<vmem>>, %arg8: memref<1x256xf32, #tpu.memory_space<vmem>>, %arg9: memref<1x16x256xf32, #tpu.memory_space<vmem>>, %arg10: memref<16x256xf32, #tpu.memory_space<vmem>>) attributes {dimension_semantics = [#tpu.dimension_semantics<parallel>, #tpu.dimension_semantics<parallel>, #tpu.dimension_semantics<arbitrary>], iteration_bounds = array<i64: 2, 1, 1>, scalar_prefetch = 0 : i64, scratch_operands = 1 : i64, tpu.core_type = #tpu.core_type<tc>, window_params = [{transform_indices = @transform_0, window_bounds = array<i64: 1, 16, 32>}, {transform_indices = @transform_1, window_bounds = array<i64: 32, 256>}, {pipeline_mode = #tpu.pipeline_mode<synchronous>, transform_indices = @transform_2, window_bounds = array<i64: 1, 256>}, {transform_indices = @transform_3, window_bounds = array<i64: 16, 256>}, {pipeline_mode = #tpu.pipeline_mode<synchronous>, transform_indices = @transform_4, window_bounds = array<i64: 1, 256>}, {pipeline_mode = #tpu.pipeline_mode<synchronous>, transform_indices = @transform_5, window_bounds = array<i64: 1, 256>}, {transform_indices = @transform_6, window_bounds = array<i64: 1, 16, 256>}]} {
    %c0_i32 = arith.constant 0 : i32
    %0 = arith.cmpi eq, %arg2, %c0_i32 : i32
    %1 = arith.extui %0 : i1 to i32
    %c0_i32_0 = arith.constant 0 : i32
    %2 = arith.cmpi ne, %1, %c0_i32_0 : i32
    scf.if %2 {
      %cst_11 = arith.constant 0.000000e+00 : f32
      %13 = vector.broadcast %cst_11 : f32 to vector<16x256xf32>
      %c0_12 = arith.constant 0 : index
      %c0_13 = arith.constant 0 : index
      %14 = vector.load %arg10[%c0_12, %c0_13] : memref<16x256xf32, #tpu.memory_space<vmem>>, vector<16x256xf32>
      tpu.vector_store %arg10[%c0_12, %c0_13], %13 {strides = array<i32>} : memref<16x256xf32, #tpu.memory_space<vmem>>, vector<16x256xf32>,
    } else {
    }
    %c0 = arith.constant 0 : index
    %c0_1 = arith.constant 0 : index
    %3 = vector.load %arg10[%c0, %c0_1] : memref<16x256xf32, #tpu.memory_space<vmem>>, vector<16x256xf32>
    %c0_2 = arith.constant 0 : index
    %c0_3 = arith.constant 0 : index
    %c0_4 = arith.constant 0 : index
    %4 = vector.load %arg3[%c0_2, %c0_3, %c0_4] : memref<1x16x32xf32, #tpu.memory_space<vmem>>, vector<1x16x32xf32>
    %5 = vector.shape_cast %4 : vector<1x16x32xf32> to vector<16x32xf32>
    %c0_5 = arith.constant 0 : index
    %c0_6 = arith.constant 0 : index
    %6 = vector.load %arg4[%c0_5, %c0_6] : memref<32x256xf32, #tpu.memory_space<vmem>>, vector<32x256xf32>
    %cst = arith.constant dense<0.000000e+00> : vector<16x256xf32>
    %7 = tpu.matmul %5, %6, %cst {dimension_numbers = #tpu.dot_dimension_numbers<[1], [0], [0], [1], [0, 0, 1, 1], [], []>} : vector<16x32xf32>, vector<32x256xf32>, vector<16x256xf32> -> vector<16x256xf32>
    %8 = arith.addf %3, %7 : vector<16x256xf32>
    %c0_7 = arith.constant 0 : index
    %c0_8 = arith.constant 0 : index
    %9 = vector.load %arg10[%c0_7, %c0_8] : memref<16x256xf32, #tpu.memory_space<vmem>>, vector<16x256xf32>
    tpu.vector_store %arg10[%c0_7, %c0_8], %8 {strides = array<i32>} : memref<16x256xf32, #tpu.memory_space<vmem>>, vector<16x256xf32>,
    %c0_i32_9 = arith.constant 0 : i32
    %10 = arith.cmpi eq, %arg2, %c0_i32_9 : i32
    %11 = arith.extui %10 : i1 to i32
    %c0_i32_10 = arith.constant 0 : i32
    %12 = arith.cmpi ne, %11, %c0_i32_10 : i32
    scf.if %12 {
      %c0_11 = arith.constant 0 : index
      %c0_12 = arith.constant 0 : index
      %13 = vector.load %arg10[%c0_11, %c0_12] : memref<16x256xf32, #tpu.memory_space<vmem>>, vector<16x256xf32>
      %c0_13 = arith.constant 0 : index
      %c0_14 = arith.constant 0 : index
      %14 = vector.load %arg5[%c0_13, %c0_14] : memref<1x256xf32, #tpu.memory_space<vmem>>, vector<1x256xf32>
      %15 = vector.broadcast %14 : vector<1x256xf32> to vector<16x256xf32>
      %16 = arith.addf %13, %15 : vector<16x256xf32>
      %c0_15 = arith.constant 0 : index
      %c0_16 = arith.constant 0 : index
      %17 = vector.load %arg6[%c0_15, %c0_16] : memref<16x256xf32, #tpu.memory_space<vmem>>, vector<16x256xf32>
      %18 = arith.addf %16, %17 : vector<16x256xf32>
      %cst_17 = arith.constant dense<0.000000e+00> : vector<16xf32>
      %19 = vector.multi_reduction <add>, %18, %cst_17 [1] : vector<16x256xf32> to vector<16xf32>
      %20 = vector.shape_cast %19 : vector<16xf32> to vector<16x1xf32>
      %cst_18 = arith.constant 2.560000e+02 : f32
      %21 = vector.broadcast %cst_18 : f32 to vector<16x1xf32>
      %22 = arith.divf %20, %21 : vector<16x1xf32>
      %23 = vector.broadcast %22 : vector<16x1xf32> to vector<16x256xf32>
      %24 = arith.subf %18, %23 : vector<16x256xf32>
      %25 = arith.mulf %24, %24 : vector<16x256xf32>
      %cst_19 = arith.constant dense<0.000000e+00> : vector<16xf32>
      %26 = vector.multi_reduction <add>, %25, %cst_19 [1] : vector<16x256xf32> to vector<16xf32>
      %27 = vector.shape_cast %26 : vector<16xf32> to vector<16x1xf32>
      %cst_20 = arith.constant 2.560000e+02 : f32
      %28 = vector.broadcast %cst_20 : f32 to vector<16x1xf32>
      %29 = arith.divf %27, %28 : vector<16x1xf32>
      %cst_21 = arith.constant 9.99999974E-6 : f32
      %30 = vector.broadcast %cst_21 : f32 to vector<16x1xf32>
      %31 = arith.addf %29, %30 : vector<16x1xf32>
      %32 = math.rsqrt %31 : vector<16x1xf32>
      %33 = vector.broadcast %32 : vector<16x1xf32> to vector<16x256xf32>
      %34 = arith.mulf %24, %33 : vector<16x256xf32>
      %c0_22 = arith.constant 0 : index
      %c0_23 = arith.constant 0 : index
      %35 = vector.load %arg7[%c0_22, %c0_23] : memref<1x256xf32, #tpu.memory_space<vmem>>, vector<1x256xf32>
      %36 = vector.broadcast %35 : vector<1x256xf32> to vector<16x256xf32>
      %37 = arith.mulf %34, %36 : vector<16x256xf32>
      %c0_24 = arith.constant 0 : index
      %c0_25 = arith.constant 0 : index
      %38 = vector.load %arg8[%c0_24, %c0_25] : memref<1x256xf32, #tpu.memory_space<vmem>>, vector<1x256xf32>
      %39 = vector.broadcast %38 : vector<1x256xf32> to vector<16x256xf32>
      %40 = arith.addf %37, %39 : vector<16x256xf32>
      %c0_26 = arith.constant 0 : index
      %c0_27 = arith.constant 0 : index
      %c0_28 = arith.constant 0 : index
      %41 = vector.load %arg9[%c0_26, %c0_27, %c0_28] : memref<1x16x256xf32, #tpu.memory_space<vmem>>, vector<1x16x256xf32>
      %42 = vector.shape_cast %41 : vector<1x16x256xf32> to vector<16x256xf32>
      %43 = vector.shape_cast %40 : vector<16x256xf32> to vector<1x16x256xf32>
      tpu.vector_store %arg9[%c0_26, %c0_27, %c0_28], %43 {strides = array<i32>} : memref<1x16x256xf32, #tpu.memory_space<vmem>>, vector<1x16x256xf32>,
    } else {
    }
    return
  }
  func.func @transform_0(%arg0: i32, %arg1: i32, %arg2: i32) -> (i32, i32, i32) {
    %c0_i32 = arith.constant 0 : i32
    return %arg0, %arg1, %arg2 : i32, i32, i32
  }
  func.func @transform_1(%arg0: i32, %arg1: i32, %arg2: i32) -> (i32, i32) {
    %c0_i32 = arith.constant 0 : i32
    %c0_i32_0 = arith.constant 0 : i32
    return %arg2, %c0_i32 : i32, i32
  }
  func.func @transform_2(%arg0: i32, %arg1: i32, %arg2: i32) -> (i32, i32) {
    %c0_i32 = arith.constant 0 : i32
    %c0_i32_0 = arith.constant 0 : i32
    %c0_i32_1 = arith.constant 0 : i32
    return %c0_i32, %c0_i32_0 : i32, i32
  }
  func.func @transform_3(%arg0: i32, %arg1: i32, %arg2: i32) -> (i32, i32) {
    %c0_i32 = arith.constant 0 : i32
    %c0_i32_0 = arith.constant 0 : i32
    return %arg1, %c0_i32 : i32, i32
  }
  func.func @transform_4(%arg0: i32, %arg1: i32, %arg2: i32) -> (i32, i32) {
    %c0_i32 = arith.constant 0 : i32
    %c0_i32_0 = arith.constant 0 : i32
    %c0_i32_1 = arith.constant 0 : i32
    return %c0_i32, %c0_i32_0 : i32, i32
  }
  func.func @transform_5(%arg0: i32, %arg1: i32, %arg2: i32) -> (i32, i32) {
    %c0_i32 = arith.constant 0 : i32
    %c0_i32_0 = arith.constant 0 : i32
    %c0_i32_1 = arith.constant 0 : i32
    return %c0_i32, %c0_i32_0 : i32, i32
  }
  func.func @transform_6(%arg0: i32, %arg1: i32, %arg2: i32) -> (i32, i32, i32) {
    %c0_i32 = arith.constant 0 : i32
    %c0_i32_0 = arith.constant 0 : i32
    return %arg0, %arg1, %c0_i32 : i32, i32, i32
  }
}

</mosaic_0001>

<bundles_post_ra>
// kernel: tpu_custom_call.1
= control target key start
LH: loop header
LB: loop body
LE: loop exit
PB: predicated region body
PF: predicated region fallthrough
CT: control target
= control target key end

     0   :  { %11 = vsyncpa [#allocation4], 0  ;;  %s1308_s0 = inlined_call_operand.hbm [shape: f32[2,16,32], index: 0, kind: input, shape index: {}]   ;;  %s1309_s1 = inlined_call_operand.hbm [shape: f32[32,256], index: 1, kind: input, shape index: {}]   ;;  %s1310_s2 = inlined_call_operand.vmem [shape: f32[1,256], index: 2, kind: input, shape index: {}]   ;;  %s1311_s3 = inlined_call_operand.hbm [shape: f32[16,256], index: 3, kind: input, shape index: {}]   ;;  %s1312_s4 = inlined_call_operand.vmem [shape: f32[1,256], index: 4, kind: input, shape index: {}]   ;;  %s1313_s5 = inlined_call_operand.vmem [shape: f32[1,256], index: 5, kind: input, shape index: {}]   ;;  %s1314_s6 = inlined_call_operand.hbm [shape: f32[2,16,256], index: 6, kind: output, shape index: {}]  }
   0x1   :  { %13 = vsyncpa [#allocation4 + $0x1], 0 }
   0x2   :  { %14 = vsyncpa [#allocation7], 0 }
   0x3   :  { %15 = vsyncpa [#allocation5], 0 }
   0x4   :  { %17 = vsyncpa [#allocation5 + $0x1], 0  ;;  %s1043_s21 = smov 0   ;;  %s1045_s22 = smov 0  }
   0x5   :  { %s1047_s23 = smov 0   ;;  %s1049_s24 = smov 0  }
   0x6   :  { %s1051_s25 = smov 0   ;;  %s1053_s26 = smov 0  }
   0x7 LB: > { %s694_s27 = sadd.s32 4294967295, %s995_s26   ;;  %s695_s28 = sadd.s32 4294967294, %s995_s26   ;;  %s995_s26 = sphi %s1053_s26, %s23_s26   ;;  %s991_s25 = sphi %s1051_s25, %s1339_s25   ;;  %s987_s24 = sphi %s1049_s24, %s1338_s24   ;;  %s983_s23 = sphi %s1047_s23, %s1337_s23   ;;  %s979_s22 = sphi %s1045_s22, %s1336_s22   ;;  %s975_s21 = sphi %s1043_s21, %s1335_s21  }
   0x8   : > { %p66_p0 = scmp.ne.s32.totalorder %s979_s22, %s975_s21  ;;  %p1077_p1 = scmp.eq.s32.totalorder %s694_s27, 0 }
   0x9   : > { %p1081_p2 = scmp.eq.s32.totalorder %s694_s27, 1  ;;  %p213_p3 = scmp.eq.s32.totalorder %s695_s28, 1 }
   0xa   : > { %s1320_s29 = scalar_select %p1077_p1, 1, 0 }
   0xb   : > { %p1087_p4 = por %p1077_p1, %p66_p0  ;;  %p696_p5 = scmp.ge.s32.totalorder %s995_s26, 1 }
   0xc   : > { %p1092_p6 = por %p213_p3, %p66_p0  ;;  %p220_p7 = scmp.lt.s32.totalorder %s995_s26, 3 }
   0xd   : > { %s1322_s7 = scalar_select %p1087_p4, 1, 0 }
   0xe   : > { %s1323_s8 = scalar_select %p1092_p6, 1, 0 }
   0xf   : > { %p1097_p8 = pnand %p696_p5, %p220_p7  ;;  %s997_s10 = smov [#allocation6]  }
  0x10   : > { %1324 = sst [smem:[#allocation13_spill]] %s1323_s8  ;;  %s236_s11 = sshll.u32 %s997_s10, 4  ;;  %s1101_s11 = int_to_ptr.vmem [resolvable:$true] %s236_s11 }
  0x11   : > { %p741_p9 = pneg %p1097_p8  ;;  %s998_s13 = smov [#allocation8]  }
  0x12   : > { %s256_s14 = sshll.u32 %s998_s13, 4  ;;  %s823_s17 = scalar_lea.hbm %s1309_s1, 1024  ;;  %s1112_s14 = int_to_ptr.vmem [resolvable:$true] %s256_s14 }
  0x13   : > { %p1108_p11 = pnand %p741_p9, %p1077_p1  ;;  %p824_p12 = scmp.ne.s32.totalorder %s1309_s1, %s823_s17 }
  0x14   : > { %p830_p5 = scmp.lt.u32.totalorder %s823_s17, %s1309_s1 }
  0x15   : > { %p825_p13 = pneg %p1108_p11 }
  0x17   : > { %p826_p0 = pnand %p825_p13, %p824_p12 }
  0x19   : > { %p827_p3 = pneg %p826_p0 }
  0x1b   : > { %p832_p7 = pnand %p830_p5, %p827_p3 }
  0x1d   : > { %835 = shalt.err (!%p832_p7)
}
  0x1e   : > { %s836_s28 = scalar_lea.vmem %s1101_s11, 1024  ;;  %p844_p1 = scmp.lt.s32.totalorder %s1101_s11, %s1101_s11 }
  0x1f   : > { %p837_p9 = scmp.ne.s32.totalorder %s1101_s11, %s836_s28  ;;  %p845_p12 = scmp.lt.s32.totalorder %s836_s28, %s836_s28 }
  0x21   : > { %p839_p10 = pnand %p837_p9, %p825_p13  ;;  %p846_p0 = por %p845_p12, %p844_p1 }
  0x23   : > { %p840_p6 = pneg %p839_p10 }
  0x25   : > { %p847_p4 = pnand %p846_p0, %p840_p6 }
  0x27   : > { %850 = shalt.err (!%p847_p4)
}
  0x28   : > { %s999_s10 = smov 256   ;;  %s1000_s13 = smov 16  }
  0x29   : > { %744 = dma.hbm_to_vmem [thread:$0]  (!%p1108_p11), %s1309_s1, 1024, %s1101_s11, [#allocation7], %s999_s10, %s999_s10, %s1000_s13  }
  0x2a   : > { %s851_s19 = scalar_lea.hbm %s1311_s3, 512 }
  0x2b   : > { %p852_p1 = scmp.ne.s32.totalorder %s1311_s3, %s851_s19  ;;  %p858_p10 = scmp.lt.u32.totalorder %s851_s19, %s1311_s3 }
  0x2d   : > { %p854_p4 = pnand %p852_p1, %p825_p13 }
  0x2f   : > { %p855_p6 = pneg %p854_p4 }
  0x31   : > { %p860_p3 = pnand %p858_p10, %p855_p6 }
  0x33   : > { %863 = shalt.err (!%p860_p3)
}
  0x34   : > { %s864_s11 = scalar_lea.vmem %s1112_s14, 512  ;;  %p872_p12 = scmp.lt.s32.totalorder %s1112_s14, %s1112_s14 }
  0x35   : > { %p865_p5 = scmp.ne.s32.totalorder %s1112_s14, %s864_s11  ;;  %p873_p0 = scmp.lt.s32.totalorder %s864_s11, %s864_s11 }
  0x37   : > { %p867_p7 = pnand %p865_p5, %p825_p13  ;;  %p874_p1 = por %p873_p0, %p872_p12 }
  0x39   : > { %p868_p9 = pneg %p867_p7 }
  0x3b   : > { %p875_p4 = pnand %p874_p1, %p868_p9 }
  0x3d   : > { %878 = shalt.err (!%p875_p4)
}
  0x3e   : > { %747 = dma.hbm_to_vmem [thread:$0]  (!%p1108_p11), %s1311_s3, 512, %s1112_s14, [#allocation7], %s999_s10, %s999_s10, %s1000_s13  }
  0x3f   : > { %s42_s16 = sadd.s32 1, %s991_s25  ;;  %s53_s17 = sadd.s32 1, %s983_s23 }
  0x40   : > { %p44_p13 = scmp.ge.s32.totalorder %s42_s16, 2  ;;  %p60_p6 = scmp.ne.s32.totalorder %s983_s23, %s979_s22 }
  0x41   : > { %p61_p10 = scmp.eq.s32.totalorder %s995_s26, 0  ;;  %p758_p3 = scmp.lt.s32.totalorder %s995_s26, 2 }
  0x42   : > { %s1341_s16 = smov (%p44_p13, %s42_s16), 0  ;;  %p1176_p7 = por %p1081_p2, %p60_p6 }
  0x43   : > { %p62_p5 = por %p61_p10, %p60_p6  ;;  %s46_s18 = ssub.s32 %s991_s25, %s1341_s16 }
  0x44   : > { %s1327_s12 = scalar_select %p1176_p7, 1, 0 }
  0x45   : > { %s276_s19 = sand.u32 1, %s983_s23   ;;  %p51_p9 = scmp.eq.s32.totalorder %s46_s18, 0 }
  0x46   : > { %s700_s14 = sshll.u32 %s276_s19, 4  ;;  %s715_s10 = sshll.u32 %s991_s25, 8 }
  0x47   : > { %s1185_s13 = scalar_select %p51_p9, %s983_s23, %s53_s17  }
  0x48   : > { %s1190_s28 = scalar_lea.hbm %s1308_s0, %s715_s10  ;;  %s280_s30 = scalar_lea.vmem [#allocation3], %s700_s14 }
  0x49   : > { %s290_s11 = sshll.u32 %s280_s30, 4  ;;  %p1194_p2 = pnand %p758_p3, %p62_p5  ;;  %s1198_s11 = int_to_ptr.vmem [resolvable:$true] %s290_s11 }
  0x4a   : > { %s1200_s15 = scalar_lea.sflag [#allocation4], %s276_s19  ;;  %s879_s17 = scalar_lea.hbm %s1190_s28, 256 }
  0x4b   : > { %p880_p11 = scmp.ne.s32.totalorder %s1190_s28, %s879_s17  ;;  %p881_p12 = pneg %p1194_p2 }
  0x4c   : > { %s884_s10 = scalar_lea.hbm %s1308_s0, 512  ;;  %p885_p4 = scmp.lt.u32.totalorder %s1190_s28, %s1308_s0 }
  0x4d   : > { %p882_p0 = pnand %p881_p12, %p880_p11  ;;  %p886_p13 = scmp.lt.u32.totalorder %s884_s10, %s879_s17 }
  0x4e   : > { %p888_p10 = scmp.lt.u32.totalorder %s879_s17, %s1190_s28 }
  0x4f   : > { %p883_p1 = pneg %p882_p0  ;;  %p887_p6 = por %p886_p13, %p885_p4 }
  0x51   : > { %p889_p3 = por %p888_p10, %p887_p6 }
  0x53   : > { %p890_p5 = pnand %p889_p3, %p883_p1 }
  0x55   : > { %893 = shalt.err (!%p890_p5)
}
  0x56   : > { %s894_s19 = scalar_lea.vmem %s1198_s11, 256  ;;  %s1001_s30 = smov [#allocation3]  }
  0x57   : > { %p895_p9 = scmp.ne.s32.totalorder %s1198_s11, %s894_s19  ;;  %s899_s18 = sshll.u32 %s1001_s30, 4  ;;  %s900_s18 = int_to_ptr.vmem [resolvable:$false] %s899_s18 }
  0x58   : > { %s901_s14 = scalar_lea.vmem %s900_s18, 512  ;;  %p902_p7 = scmp.lt.s32.totalorder %s1198_s11, %s900_s18 }
  0x59   : > { %p897_p11 = pnand %p895_p9, %p881_p12  ;;  %p903_p4 = scmp.lt.s32.totalorder %s901_s14, %s894_s19 }
  0x5b   : > { %p898_p0 = pneg %p897_p11  ;;  %p904_p13 = por %p903_p4, %p902_p7 }
  0x5d   : > { %p905_p6 = pnand %p904_p13, %p898_p0 }
  0x5f   : > { %908 = shalt.err (!%p905_p6)
}
  0x60   : > { %s1002_s17 = smov 128   ;;  %s1003_s10 = smov 8  }
  0x61   : > { %751 = dma.hbm_to_vmem [thread:$0]  (!%p1194_p2), %s1190_s28, 256, %s1198_s11, %s1200_s15, %s1002_s17, %s1002_s17, %s1003_s10  }
  0x62   : > { %302 = sbr.rel (%p1097_p8) target bundleno = 671 (0x29f), region = 44  ;;  %s1231_s20 = sand.u32 (!%p1097_p8), 1, %s979_s22  }
  0x63   : > { %s704_s27 = sshll.u32 (!%p1097_p8), %s1231_s20, 4  ;;  %s305_s19 = scalar_lea.sflag (!%p1097_p8), [#allocation4], %s1231_s20 }
  0x64   : > { %s308_s30 = scalar_lea.vmem (!%p1097_p8), [#allocation3], %s704_s27  ;;  %p1329_p7 = scmp.ne.s32.totalorder (!%p1097_p8), %s1322_s7, 0 }
  0x69   : > { %962 = dma.done.wait (%p1329_p7), %s305_s19, 256  }
  0x6a   : > { %964 = vsyncadd (%p1329_p7), %s305_s19, 4294967040  ;;  %p1330_p12 = scmp.ne.s32.totalorder %s1320_s29, 0 }
  0x6c   : > { %966 = dma.done.wait (%p1330_p12), [#allocation7], 1536  }
  0x6d   : > { %968 = vsyncadd (%p1330_p12), [#allocation7], 4294965760  ;;  %v1004_v0 = vmov 0.0   ;;  %v364_v1 = vld [vmem:[#allocation6 + $0x8] sm:$0xff]  ;;  %v366_v2 = vld [vmem:[#allocation6 + $0x18] sm:$0xff]  ;;  %vm371_vm0 = vcmask 261120   ;;  %v472_v15 = vlaneseq }
  0x6e   : > { %442 = vmatprep.mubr.f32.mxu0 %v1004_v0  ;;  %448 = vmatprep.mubr.f32.mxu1 %v1004_v0  ;;  %v363_v3 = vld [vmem:[#allocation6] sm:$0xff]  ;;  %v717_v4 = vpack.c.bf16 %v366_v2, %v364_v1  ;;  %v365_v5 = vld [vmem:[#allocation6 + $0x10] sm:$0xff]  ;;  %v368_v6 = vld [vmem:[#allocation6 + $0x28] sm:$0xff]  ;;  %s707_s15 = sshll.u32 %s1231_s20, 5  ;;  %s716_s18 = sshll.u32 %s987_s24, 9 }
  0x6f   : > { %v370_v7 = vld [vmem:[#allocation6 + $0x38] sm:$0xff]  ;;  %v719_v8 = vpack.c.bf16 %v365_v5, %v363_v3  ;;  %v367_v10 = vld [vmem:[#allocation6 + $0x20] sm:$0xff]  ;;  %v369_v11 = vld [vmem:[#allocation6 + $0x30] sm:$0xff]  ;;  %v473_v16 = vshrl.u32 %v472_v15, 7  ;;  %s344_s14 = scalar_lea.vmem [#allocation9], %s707_s15  ;;  %s1257_s19 = scalar_lea.hbm %s1314_s6, %s716_s18 }
  0x70   : > { %v721_v9 = vpack.c.bf16 %v370_v7, %v368_v6  ;;  %718 = vmatprep.subr.bf16.mxu0 %v717_v4  ;;  %725 = vmatprep.subr.bf16.mxu1 %v717_v4  ;;  %v723_v12 = vpack.c.bf16 %v369_v11, %v367_v10  ;;  %v361_v13 = vld [vmem:[%s308_s30] sm:$0xff]  ;;  %v362_v14 = vld [vmem:[%s308_s30 + $0x8] sm:$0xff]  ;;  %s580_s17 = sshll.u32 %s344_s14, 4  ;;  %s564_s24 = scalar_lea.sflag [#allocation5], %s1231_s20  ;;  %s1259_s17 = int_to_ptr.vmem [resolvable:$true] %s580_s17 }
  0x71   : > { %720 = vmatpush1.bf16.msra.mxu0 %v719_v8  ;;  %727 = vmatpush1.bf16.msra.mxu1 %v719_v8  ;;  %v474_v17 = vsub.s32 0, %v473_v16  ;;  %v470_v18 = vld [vmem:[%s1310_s2] sm:$0x3]  ;;  %v478_v19 = vsub.s32 1, %v473_v16  ;;  %v488_v28 = vld [vmem:[#allocation8 + $0x10] sm:$0xff]  ;;  %v489_v30 = vld [vmem:[#allocation8 + $0x18] sm:$0xff] }
  0x72   : > { %722 = vmatprep.subr.bf16.mxu0 %v721_v9  ;;  %726 = vmatprep.subr.bf16.mxu1 %v721_v9  ;;  %v486_v24 = vld [vmem:[#allocation8] sm:$0xff]  ;;  %v487_v31 = vld [vmem:[#allocation8 + $0x8] sm:$0xff]  ;;  %s909_s30 = scalar_lea.vmem %s1259_s17, 512  ;;  %p1331_p2 = scmp.ne.s32.totalorder %s1327_s12, 0 }
  0x73   : > { %v475_v20 = vrot.slane %v470_v18, %v474_v17  ;;  %v479_v21 = vrot.slane %v470_v18, %v478_v19  ;;  %v527_v60 = vld [vmem:[%s1312_s4] sm:$0x3]  ;;  %p910_p8 = scmp.ne.s32.totalorder %s1259_s17, %s909_s30  ;;  %s1005_s29 = smov [#allocation9]  }
  0x74   : > { %v543_v61 = vld [vmem:[%s1313_s5] sm:$0x3]  ;;  %v532_v62 = vrot.slane %v527_v60, %v474_v17  ;;  %v536_v63 = vrot.slane %v527_v60, %v478_v19  ;;  %s913_s7 = sshll.u32 %s1005_s29, 4  ;;  %s914_s7 = int_to_ptr.vmem [resolvable:$false] %s913_s7 }
  0x75   : > { %724 = vmatpush1.bf16.msra.mxu0 %v723_v12  ;;  %728 = vmatpush1.bf16.msra.mxu1 %v723_v12  ;;  %v548_v1 = vrot.slane %v543_v61, %v474_v17  ;;  %v552_v2 = vrot.slane %v543_v61, %v478_v19  ;;  %p911_p1 = pnand %p910_p8, %p1331_p2  ;;  %s915_s9 = scalar_lea.vmem %s914_s7, 1024 }
  0x76   : > { %p916_p3 = scmp.lt.s32.totalorder %s1259_s17, %s914_s7  ;;  %p917_p5 = scmp.lt.s32.totalorder %s915_s9, %s909_s30 }
  0x77   : > { %p912_p10 = pneg %p911_p1 }
  0x78   : > { %708 = vmatmul.mubr.msk.f32.vlgmr.msra.gmra.mrb[0].mxu0 %vm371_vm0, %v361_v13  ;;  %709 = vmatmul.mubr.msk.f32.vlgmr.msra.gmra.mrb[0].mxu1 %vm371_vm0, %v362_v14  ;;  %p918_p9 = por %p917_p5, %p916_p3 }
  0x7a   : > { %p919_p11 = pnand %p918_p9, %p912_p10 }
 0x14b   : > { %v444_v22 = vpop.f32.mrb[0].mxu0  ;;  %v450_v23 = vpop.f32.mrb[0].mxu1 }
 0x14c   : > { %v482_v25 = vadd.f32 %v475_v20, %v444_v22  ;;  %v446_v26 = vpop.f32.mrb[1].mxu0  ;;  %v484_v27 = vadd.f32 %v475_v20, %v450_v23  ;;  %v452_v29 = vpop.f32.mrb[1].mxu1 }
 0x14d   : > { %v483_v32 = vadd.f32 %v479_v21, %v446_v26  ;;  %v485_v33 = vadd.f32 %v479_v21, %v452_v29 }
 0x14e   : > { %v490_v34 = vadd.f32 %v486_v24, %v482_v25  ;;  %v492_v35 = vadd.f32 %v488_v28, %v484_v27 }
 0x14f   : > { %v493_v36 = vadd.f32 %v489_v30, %v485_v33  ;;  %v491_v37 = vadd.f32 %v487_v31, %v483_v32 }
 0x151   : > { %v494_v38 = vadd.f32 %v491_v37, %v490_v34  ;;  %v497_v39 = vadd.f32 %v493_v36, %v492_v35 }
 0x153   : > { %495 = vadd.xlane.f32.xlu0 %v494_v38 }
 0x157   : > { %498 = vadd.xlane.f32.xlu0 %v497_v39 }
 0x1e0   : > { %v496_v40 = vpop.xlane.xlu0 %495 }
 0x1e1   : > { %v501_v41 = vmul.f32 0.00390625, %v496_v40 }
 0x1e3   : > { %v503_v42 = vsub.f32 %v490_v34, %v501_v41  ;;  %v504_v43 = vsub.f32 %v491_v37, %v501_v41 }
 0x1e4   : > { %v499_v44 = vpop.xlane.xlu0 %498 }
 0x1e5   : > { %v502_v45 = vmul.f32 0.00390625, %v499_v44  ;;  %v507_v46 = vmul.f32 %v503_v42, %v503_v42  ;;  %v508_v47 = vmul.f32 %v504_v43, %v504_v43 }
 0x1e7   : > { %v505_v48 = vsub.f32 %v492_v35, %v502_v45  ;;  %v506_v49 = vsub.f32 %v493_v36, %v502_v45  ;;  %v511_v50 = vadd.f32 %v508_v47, %v507_v46 }
 0x1e9   : > { %512 = vadd.xlane.f32.xlu1 %v511_v50  ;;  %v509_v51 = vmul.f32 %v505_v48, %v505_v48  ;;  %v510_v52 = vmul.f32 %v506_v49, %v506_v49 }
 0x1eb   : > { %v514_v53 = vadd.f32 %v510_v52, %v509_v51 }
 0x1ed   : > { %515 = vadd.xlane.f32.xlu1 %v514_v53 }
 0x276   : > { %v513_v54 = vpop.xlane.xlu1 %512 }
 0x277   : > { %v517_v55 = vmul.f32 0.00390625, %v513_v54 }
 0x279   : > { %v519_v56 = vadd.f32 1e-05, %v517_v55 }
 0x27a   : > { %v516_v57 = vpop.xlane.xlu1 %515 }
 0x27b   : > { %819 = vrsqrt.f32 %v519_v56  ;;  %v518_v58 = vmul.f32 0.00390625, %v516_v57 }
 0x27d   : > { %v520_v59 = vadd.f32 1e-05, %v518_v58 }
 0x27f   : > { %821 = vrsqrt.f32 %v520_v59 }
 0x285   : > { %v820_v0 = vpop.eup %819 }
 0x286   : > { %v523_v3 = vmul.f32 %v820_v0, %v503_v42  ;;  %v524_v4 = vmul.f32 %v820_v0, %v504_v43 }
 0x288   : > { %v539_v5 = vmul.f32 %v532_v62, %v523_v3  ;;  %v540_v6 = vmul.f32 %v536_v63, %v524_v4 }
 0x289   : > { %v822_v7 = vpop.eup %821 }
 0x28a   : > { %v555_v8 = vadd.f32 %v548_v1, %v539_v5  ;;  %v556_v9 = vadd.f32 %v552_v2, %v540_v6  ;;  %v525_v10 = vmul.f32 %v822_v7, %v505_v48  ;;  %v526_v11 = vmul.f32 %v822_v7, %v506_v49 }
 0x28c   : > { %559 = vst [vmem:[%s344_s14] sm:$0xff] %v555_v8  ;;  %560 = vst [vmem:[%s344_s14 + $0x8] sm:$0xff] %v556_v9  ;;  %v541_v12 = vmul.f32 %v532_v62, %v525_v10  ;;  %v542_v13 = vmul.f32 %v536_v63, %v526_v11 }
 0x28e   : > { %v557_v14 = vadd.f32 %v548_v1, %v541_v12  ;;  %v558_v15 = vadd.f32 %v552_v2, %v542_v13 }
 0x290   : > { %561 = vst [vmem:[%s344_s14 + $0x10] sm:$0xff] %v557_v14  ;;  %562 = vst [vmem:[%s344_s14 + $0x18] sm:$0xff] %v558_v15 }
 0x291   : > { %922 = shalt.err (!%p919_p11)
}
 0x292   : > { %s923_s28 = scalar_lea.hbm %s1257_s19, 512  ;;  %s927_s15 = scalar_lea.hbm %s1314_s6, 1024 }
 0x293   : > { %p924_p0 = scmp.ne.s32.totalorder %s1257_s19, %s923_s28  ;;  %p928_p6 = scmp.lt.u32.totalorder %s1257_s19, %s1314_s6 }
 0x294   : > { %p929_p7 = scmp.lt.u32.totalorder %s927_s15, %s923_s28  ;;  %p931_p8 = scmp.lt.u32.totalorder %s923_s28, %s1257_s19 }
 0x295   : > { %p925_p4 = pnand %p924_p0, %p1331_p2 }
 0x296   : > { %p930_p12 = por %p929_p7, %p928_p6 }
 0x297   : > { %p926_p13 = pneg %p925_p4 }
 0x298   : > { %p932_p1 = por %p931_p8, %p930_p12 }
 0x29a   : > { %p933_p10 = pnand %p932_p1, %p926_p13 }
 0x29c   : > { %936 = shalt.err (!%p933_p10)
}
 0x29d   : > { %s1006_s10 = smov 256   ;;  %s1007_s27 = smov 16  }
 0x29e   : > { %739 = dma.vmem_to_hbm [thread:$0]  (%p1331_p2), %s1259_s17, 512, %s1257_s19, %s564_s24, %s1006_s10, %s1006_s10, %s1007_s27  }
 0x29f PF: > { %s1332_s30 = sld [smem:[#allocation13_spill]]  ;;  %s595_s29 = sand.u32 1, %s975_s21  }
 0x2a0   : > { %p1334_p5 = scmp.ge.s32.totalorder %s995_s26, 2  ;;  %s596_s7 = scalar_lea.sflag [#allocation5], %s595_s29 }
 0x2a5   : > { %p1333_p3 = scmp.ne.s32.totalorder %s1332_s30, 0 }
 0x2a7   : > { %p753_p9 = pnand %p1334_p5, %p1333_p3 }
 0x2a9   : > { %970 = dma.done.wait (!%p753_p9), %s596_s7, 512  }
 0x2aa   : > { %972 = vsyncadd (!%p753_p9), %s596_s7, 4294966784  ;;  %s23_s26 = sadd.s32 1, %s995_s26   ;;  %s1335_s21 = smov %s979_s22 }
 0x2ab   : > { %p20_p11 = scmp.ge.s32.totalorder %s23_s26, 4   ;;  %s1336_s22 = smov %s983_s23 }
 0x2ac   : > { %s1337_s23 = smov %s1185_s13  ;;  %s1338_s24 = smov %s991_s25 }
 0x2ad   : > { %s1339_s25 = smov %s1341_s16  ;;  %22 = sbr.rel (!%p20_p11) target bundleno = 7 (0x7), region = 107 }
 0x2b4   :  { %601 = vsyncpa [#allocation4], 1 }
 0x2b5   :  { %603 = vsyncpa [#allocation4 + $0x1], 1 }
 0x2b6   :  { %604 = vsyncpa [#allocation7], 1 }
 0x2b7   :  { %605 = vsyncpa [#allocation5], 1 }
 0x2b8   :  { %607 = vsyncpa [#allocation5 + $0x1], 1 }

</bundles_post_ra>
